<compile_context>
chip_gen: v5e
topology: v5e:2x2
jax: 0.10.0
libtpu: 0.0.40
codegen_flags: <defaults>
</compile_context>

<pallas_src>
import functools

import jax
import jax.numpy as jnp
import numpy as np
from jax.experimental import pallas as pl
from jax.experimental.pallas import tpu as pltpu


def _round_up(x, m):
    return ((x + m - 1) // m) * m


def _dice_kernel(score_ref, label_ref, out_ref,
                 inter_acc, ysum_acc, zsum_acc, *,
                 apply_softmax, hw, tn, needs_mask):
    k = pl.program_id(1)
    nk = pl.num_programs(1)

    @pl.when(k == 0)
    def _init():
        inter_acc[...] = jnp.zeros_like(inter_acc)
        ysum_acc[...] = jnp.zeros_like(ysum_acc)
        zsum_acc[...] = jnp.zeros_like(zsum_acc)

    score0 = score_ref[...].astype(jnp.float32)        # (C, tn) f32 (cast post-DMA)
    labels = label_ref[...]                            # (1, tn) native dtype
    n_cls = score0.shape[0]

    # "reverse" one-hot: target[c, n] = (label[n] != c), compared in the label's
    # native dtype (matches torch `input_tensor != i*ones_like(input_tensor)`).
    class_ids = jax.lax.broadcasted_iota(
        jnp.int32, (n_cls, tn), 0).astype(labels.dtype)
    tgt_bool0 = labels != class_ids                    # (C, tn) bool (broadcast)

    def accumulate(score, tgt_bool, valid):
        if valid is not None:
            score = jnp.where(valid, score, 0.0)
            tgt_bool = jnp.logical_and(tgt_bool, valid)
        if apply_softmax:
            # softmax over the class (sublane) axis, per pixel
            m = jnp.max(score, axis=0, keepdims=True)
            e = jnp.exp(score - m)
            denom = jnp.sum(e, axis=0, keepdims=True)
            score = e * pl.reciprocal(denom, approx=True)   # EUP vrcp slot
            if valid is not None:
                score = jnp.where(valid, score, 0.0)
        tgt = tgt_bool.astype(jnp.float32)
        inter_acc[...] += jnp.sum(score * tgt, axis=-1, keepdims=True)   # (C, 1)
        ysum_acc[...] += jnp.sum(tgt, axis=-1, keepdims=True)            # tgt is 0/1
        zsum_acc[...] += jnp.sum(score * score, axis=-1, keepdims=True)  # (C, 1)

    if needs_mask:
        is_last = k == nk - 1

        @pl.when(is_last)
        def _tail():
            lane = jax.lax.broadcasted_iota(jnp.int32, (1, tn), 1)
            valid = (k * tn + lane) < hw               # (1, tn) bool
            accumulate(score0, tgt_bool0, valid)

        @pl.when(jnp.logical_not(is_last))
        def _full():
            accumulate(score0, tgt_bool0, None)
    else:
        accumulate(score0, tgt_bool0, None)

    @pl.when(k == nk - 1)
    def _finalize():
        out_ref[:, 0:1] = inter_acc[...]
        out_ref[:, 1:2] = ysum_acc[...]
        out_ref[:, 2:3] = zsum_acc[...]


def dice_loss_ra(inputs, target, n_classes, weight=None, softmax=False,
                 block_n=None):
    """Pallas implementation of DiceLoss_ra.forward."""
    B, C, H, W = inputs.shape
    assert C == n_classes, "predict & target shape do not match"
    HW = H * W

    # Free reshape (no data movement); keep native dtypes for the DMAs.
    score = inputs.reshape(B, C, HW)
    labels = target.reshape(B, 1, HW)

    hw_pad = _round_up(HW, 128)
    if block_n is None:
        # Size the (C, tn) score block to ~1 MiB so each grid step moves enough
        # HBM traffic to amortize the ~0.35 us per-step overhead.  Footprint
        # (2x double-buffered score + labels + ~5 elementwise temporaries) stays
        # <~8-10 MiB, safe on v5e's 16 MiB scoped default and v7x's 64 MiB VMEM.
        elem = jnp.dtype(inputs.dtype).itemsize
        tn = max((1024 * 1024) // (C * elem), 512)
        tn = _round_up(tn, 512)
    else:
        tn = _round_up(block_n, 128)
    tn = min(tn, hw_pad)
    k_steps = pl.cdiv(HW, tn)
    needs_mask = (HW % tn) != 0

    kernel = functools.partial(
        _dice_kernel, apply_softmax=softmax, hw=HW, tn=tn, needs_mask=needs_mask)

    # Per-batch partial sums: [:, :, 0]=intersect, 1=y_sum, 2=z_sum.
    partials = pl.pallas_call(
        kernel,
        out_shape=jax.ShapeDtypeStruct((B, C, 3), jnp.float32),
        grid_spec=pltpu.PrefetchScalarGridSpec(
            num_scalar_prefetch=0,
            grid=(B, k_steps),
            in_specs=[
                # score: (B, C, HW) -> kernel block (C, tn)
                pl.BlockSpec((pl.Squeezed(), C, tn), lambda b, k: (b, 0, k)),
                # labels: (B, 1, HW) -> kernel block (1, tn), native dtype
                pl.BlockSpec((pl.Squeezed(), 1, tn), lambda b, k: (b, 0, k)),
            ],
            out_specs=pl.BlockSpec((pl.Squeezed(), C, 3), lambda b, k: (b, 0, 0)),
            scratch_shapes=[
                pltpu.VMEM((C, 1), jnp.float32),   # intersect accumulator
                pltpu.VMEM((C, 1), jnp.float32),   # y_sum accumulator
                pltpu.VMEM((C, 1), jnp.float32),   # z_sum accumulator
            ],
        ),
        compiler_params=pltpu.CompilerParams(
            # B axis parallel (per-batch partial outputs -> no shared-accumulator
            # race; unlocks both TCs on v7x), HW reduction axis arbitrary.
            dimension_semantics=("parallel", "arbitrary"),
            vmem_limit_bytes=32 * 1024 * 1024),
    )(score, labels)

    # Trivial finalize in plain JAX (keeps the weight vector out of the pipeline).
    sums = jnp.sum(partials, axis=0)                    # (C, 3)
    intersect, y_sum, z_sum = sums[:, 0], sums[:, 1], sums[:, 2]
    if weight is None:
        weight = [1.0] * n_classes
    w = jnp.asarray(weight, jnp.float32)
    smooth = 1e-5
    dice = 1.0 - (2.0 * intersect + smooth) / (z_sum + y_sum + smooth)   # (C,)
    # TODO(synk): class_wise_dice (.item() host-sync list) is unused in the
    # PyTorch return value and therefore omitted here.
    return jnp.sum(dice * w) / n_classes


def dice_loss_ra_ref(inputs, target, n_classes, weight=None, softmax=False):
    """Pure-JAX reference matching the PyTorch module."""
    x = jax.nn.softmax(inputs.astype(jnp.float32), axis=1) if softmax \
        else inputs.astype(jnp.float32)
    tgt = jnp.concatenate(
        [(target != i).astype(jnp.float32) for i in range(n_classes)], axis=1)
    if weight is None:
        weight = [1.0] * n_classes
    smooth = 1e-5
    loss = 0.0
    for i in range(n_classes):
        s = x[:, i]
        t = tgt[:, i]
        inter = jnp.sum(s * t)
        y = jnp.sum(t * t)
        z = jnp.sum(s * s)
        dice = 1.0 - (2.0 * inter + smooth) / (z + y + smooth)
        loss = loss + dice * weight[i]
    return loss / n_classes


if __name__ == "__main__":
    key = jax.random.PRNGKey(0)
    B, C, H, W = 2, 4, 16, 16
    k1, k2, k3, k4 = jax.random.split(key, 4)
    logits = jax.random.normal(k1, (B, C, H, W), jnp.float32)
    labels = jax.random.randint(k2, (B, 1, H, W), 0, C).astype(jnp.float32)

    # softmax=True path (approx reciprocal -> looser tolerance)
    out_sm = dice_loss_ra(logits, labels, n_classes=C, softmax=True)
    jax.block_until_ready(out_sm)
    ref_sm = dice_loss_ra_ref(logits, labels, n_classes=C, softmax=True)
    assert np.allclose(np.asarray(out_sm), np.asarray(ref_sm),
                       rtol=2e-3, atol=2e-3), (out_sm, ref_sm)

    # softmax=False path (exact arithmetic)
    out_raw = dice_loss_ra(logits, labels, n_classes=C, softmax=False)
    jax.block_until_ready(out_raw)
    ref_raw = dice_loss_ra_ref(logits, labels, n_classes=C, softmax=False)
    assert np.allclose(np.asarray(out_raw), np.asarray(ref_raw),
                       rtol=1e-5, atol=1e-5), (out_raw, ref_raw)

    # Multi-tile path with tail masking (HW not a multiple of the tile)
    # + per-class weights: HW = 192, block_n=128 -> 2 tiles, last one masked.
    H2, W2 = 12, 16
    logits2 = jax.random.normal(k3, (B, C, H2, W2), jnp.float32)
    labels2 = jax.random.randint(k4, (B, 1, H2, W2), 0, C).astype(jnp.float32)
    wts = [0.5, 1.0, 1.5, 2.0]
    out_tail = dice_loss_ra(logits2, labels2, n_classes=C, weight=wts,
                            softmax=True, block_n=128)
    jax.block_until_ready(out_tail)
    ref_tail = dice_loss_ra_ref(logits2, labels2, n_classes=C, weight=wts,
                                softmax=True)
    assert np.allclose(np.asarray(out_tail), np.asarray(ref_tail),
                       rtol=2e-3, atol=2e-3), (out_tail, ref_tail)

    print("KERNEL_OK")
</pallas_src>

<mosaic_0001>
module attributes {stable_mosaic.version = 11 : i64} {
  func.func @_dice_kernel(%arg0: i32, %arg1: i32, %arg2: memref<1x4x256xf32, #tpu.memory_space<vmem>>, %arg3: memref<1x1x256xf32, #tpu.memory_space<vmem>>, %arg4: memref<1x4x3xf32, #tpu.memory_space<vmem>>, %arg5: memref<4x1xf32, #tpu.memory_space<vmem>>, %arg6: memref<4x1xf32, #tpu.memory_space<vmem>>, %arg7: memref<4x1xf32, #tpu.memory_space<vmem>>) attributes {dimension_semantics = [#tpu.dimension_semantics<parallel>, #tpu.dimension_semantics<arbitrary>], iteration_bounds = array<i64: 2, 1>, scalar_prefetch = 0 : i64, scratch_operands = 3 : i64, tpu.core_type = #tpu.core_type<tc>, window_params = [{transform_indices = @transform_0, window_bounds = array<i64: 1, 4, 256>}, {transform_indices = @transform_1, window_bounds = array<i64: 1, 1, 256>}, {transform_indices = @transform_2, window_bounds = array<i64: 1, 4, 3>}]} {
    %c0_i32 = arith.constant 0 : i32
    %0 = arith.cmpi eq, %arg1, %c0_i32 : i32
    %1 = arith.extui %0 : i1 to i32
    %c0_i32_0 = arith.constant 0 : i32
    %2 = arith.cmpi ne, %1, %c0_i32_0 : i32
    scf.if %2 {
      %cst_24 = arith.constant 0.000000e+00 : f32
      %43 = vector.broadcast %cst_24 : f32 to vector<4x1xf32>
      %c0_25 = arith.constant 0 : index
      %c0_26 = arith.constant 0 : index
      %44 = vector.load %arg5[%c0_25, %c0_26] : memref<4x1xf32, #tpu.memory_space<vmem>>, vector<4x1xf32>
      tpu.vector_store %arg5[%c0_25, %c0_26], %43 {strides = array<i32>} : memref<4x1xf32, #tpu.memory_space<vmem>>, vector<4x1xf32>,
      %cst_27 = arith.constant 0.000000e+00 : f32
      %45 = vector.broadcast %cst_27 : f32 to vector<4x1xf32>
      %c0_28 = arith.constant 0 : index
      %c0_29 = arith.constant 0 : index
      %46 = vector.load %arg6[%c0_28, %c0_29] : memref<4x1xf32, #tpu.memory_space<vmem>>, vector<4x1xf32>
      tpu.vector_store %arg6[%c0_28, %c0_29], %45 {strides = array<i32>} : memref<4x1xf32, #tpu.memory_space<vmem>>, vector<4x1xf32>,
      %cst_30 = arith.constant 0.000000e+00 : f32
      %47 = vector.broadcast %cst_30 : f32 to vector<4x1xf32>
      %c0_31 = arith.constant 0 : index
      %c0_32 = arith.constant 0 : index
      %48 = vector.load %arg7[%c0_31, %c0_32] : memref<4x1xf32, #tpu.memory_space<vmem>>, vector<4x1xf32>
      tpu.vector_store %arg7[%c0_31, %c0_32], %47 {strides = array<i32>} : memref<4x1xf32, #tpu.memory_space<vmem>>, vector<4x1xf32>,
    } else {
    }
    %c0 = arith.constant 0 : index
    %c0_1 = arith.constant 0 : index
    %c0_2 = arith.constant 0 : index
    %3 = vector.load %arg2[%c0, %c0_1, %c0_2] : memref<1x4x256xf32, #tpu.memory_space<vmem>>, vector<1x4x256xf32>
    %4 = vector.shape_cast %3 : vector<1x4x256xf32> to vector<4x256xf32>
    %c0_3 = arith.constant 0 : index
    %c0_4 = arith.constant 0 : index
    %c0_5 = arith.constant 0 : index
    %5 = vector.load %arg3[%c0_3, %c0_4, %c0_5] : memref<1x1x256xf32, #tpu.memory_space<vmem>>, vector<1x1x256xf32>
    %6 = vector.shape_cast %5 : vector<1x1x256xf32> to vector<1x256xf32>
    %7 = tpu.iota {dimensions = array<i32: 0>} : vector<4x256xi32>
    %8 = arith.sitofp %7 : vector<4x256xi32> to vector<4x256xf32>
    %9 = vector.broadcast %6 : vector<1x256xf32> to vector<4x256xf32>
    %10 = arith.cmpf one, %9, %8 : vector<4x256xf32>
    %cst = arith.constant dense<0xFF800000> : vector<256xf32>
    %11 = vector.multi_reduction <maximumf>, %4, %cst [0] : vector<4x256xf32> to vector<256xf32>
    %12 = vector.shape_cast %11 : vector<256xf32> to vector<1x256xf32>
    %13 = vector.broadcast %12 : vector<1x256xf32> to vector<4x256xf32>
    %14 = arith.subf %4, %13 : vector<4x256xf32>
    %15 = math.exp %14 : vector<4x256xf32>
    %cst_6 = arith.constant dense<0.000000e+00> : vector<256xf32>
    %16 = vector.multi_reduction <add>, %15, %cst_6 [0] : vector<4x256xf32> to vector<256xf32>
    %17 = vector.shape_cast %16 : vector<256xf32> to vector<1x256xf32>
    %18 = tpu.reciprocal %17 {approx = true} : vector<1x256xf32> -> vector<1x256xf32>
    %19 = vector.broadcast %18 : vector<1x256xf32> to vector<4x256xf32>
    %20 = arith.mulf %15, %19 : vector<4x256xf32>
    %21 = arith.extui %10 : vector<4x256xi1> to vector<4x256xi32>
    %22 = arith.sitofp %21 : vector<4x256xi32> to vector<4x256xf32>
    %c0_7 = arith.constant 0 : index
    %c0_8 = arith.constant 0 : index
    %23 = vector.load %arg5[%c0_7, %c0_8] : memref<4x1xf32, #tpu.memory_space<vmem>>, vector<4x1xf32>
    %24 = arith.mulf %20, %22 : vector<4x256xf32>
    %cst_9 = arith.constant dense<0.000000e+00> : vector<4xf32>
    %25 = vector.multi_reduction <add>, %24, %cst_9 [1] : vector<4x256xf32> to vector<4xf32>
    %26 = vector.shape_cast %25 : vector<4xf32> to vector<4x1xf32>
    %27 = arith.addf %23, %26 : vector<4x1xf32>
    %c0_10 = arith.constant 0 : index
    %c0_11 = arith.constant 0 : index
    %28 = vector.load %arg5[%c0_10, %c0_11] : memref<4x1xf32, #tpu.memory_space<vmem>>, vector<4x1xf32>
    tpu.vector_store %arg5[%c0_10, %c0_11], %27 {strides = array<i32>} : memref<4x1xf32, #tpu.memory_space<vmem>>, vector<4x1xf32>,
    %c0_12 = arith.constant 0 : index
    %c0_13 = arith.constant 0 : index
    %29 = vector.load %arg6[%c0_12, %c0_13] : memref<4x1xf32, #tpu.memory_space<vmem>>, vector<4x1xf32>
    %cst_14 = arith.constant dense<0.000000e+00> : vector<4xf32>
    %30 = vector.multi_reduction <add>, %22, %cst_14 [1] : vector<4x256xf32> to vector<4xf32>
    %31 = vector.shape_cast %30 : vector<4xf32> to vector<4x1xf32>
    %32 = arith.addf %29, %31 : vector<4x1xf32>
    %c0_15 = arith.constant 0 : index
    %c0_16 = arith.constant 0 : index
    %33 = vector.load %arg6[%c0_15, %c0_16] : memref<4x1xf32, #tpu.memory_space<vmem>>, vector<4x1xf32>
    tpu.vector_store %arg6[%c0_15, %c0_16], %32 {strides = array<i32>} : memref<4x1xf32, #tpu.memory_space<vmem>>, vector<4x1xf32>,
    %c0_17 = arith.constant 0 : index
    %c0_18 = arith.constant 0 : index
    %34 = vector.load %arg7[%c0_17, %c0_18] : memref<4x1xf32, #tpu.memory_space<vmem>>, vector<4x1xf32>
    %35 = arith.mulf %20, %20 : vector<4x256xf32>
    %cst_19 = arith.constant dense<0.000000e+00> : vector<4xf32>
    %36 = vector.multi_reduction <add>, %35, %cst_19 [1] : vector<4x256xf32> to vector<4xf32>
    %37 = vector.shape_cast %36 : vector<4xf32> to vector<4x1xf32>
    %38 = arith.addf %34, %37 : vector<4x1xf32>
    %c0_20 = arith.constant 0 : index
    %c0_21 = arith.constant 0 : index
    %39 = vector.load %arg7[%c0_20, %c0_21] : memref<4x1xf32, #tpu.memory_space<vmem>>, vector<4x1xf32>
    tpu.vector_store %arg7[%c0_20, %c0_21], %38 {strides = array<i32>} : memref<4x1xf32, #tpu.memory_space<vmem>>, vector<4x1xf32>,
    %c0_i32_22 = arith.constant 0 : i32
    %40 = arith.cmpi eq, %arg1, %c0_i32_22 : i32
    %41 = arith.extui %40 : i1 to i32
    %c0_i32_23 = arith.constant 0 : i32
    %42 = arith.cmpi ne, %41, %c0_i32_23 : i32
    scf.if %42 {
      %c0_24 = arith.constant 0 : index
      %c0_25 = arith.constant 0 : index
      %43 = vector.load %arg5[%c0_24, %c0_25] : memref<4x1xf32, #tpu.memory_space<vmem>>, vector<4x1xf32>
      %c0_26 = arith.constant 0 : index
      %c0_27 = arith.constant 0 : index
      %c0_28 = arith.constant 0 : index
      %44 = vector.load %arg4[%c0_26, %c0_27, %c0_28] : memref<1x4x3xf32, #tpu.memory_space<vmem>>, vector<1x4x1xf32>
      %45 = vector.shape_cast %44 : vector<1x4x1xf32> to vector<4x1xf32>
      %46 = vector.shape_cast %43 : vector<4x1xf32> to vector<1x4x1xf32>
      tpu.vector_store %arg4[%c0_26, %c0_27, %c0_28], %46 {strides = array<i32>} : memref<1x4x3xf32, #tpu.memory_space<vmem>>, vector<1x4x1xf32>,
      %c0_29 = arith.constant 0 : index
      %c0_30 = arith.constant 0 : index
      %47 = vector.load %arg6[%c0_29, %c0_30] : memref<4x1xf32, #tpu.memory_space<vmem>>, vector<4x1xf32>
      %c0_31 = arith.constant 0 : index
      %c0_32 = arith.constant 0 : index
      %c1 = arith.constant 1 : index
      %48 = vector.load %arg4[%c0_31, %c0_32, %c1] : memref<1x4x3xf32, #tpu.memory_space<vmem>>, vector<1x4x1xf32>
      %49 = vector.shape_cast %48 : vector<1x4x1xf32> to vector<4x1xf32>
      %50 = vector.shape_cast %47 : vector<4x1xf32> to vector<1x4x1xf32>
      tpu.vector_store %arg4[%c0_31, %c0_32, %c1], %50 {strides = array<i32>} : memref<1x4x3xf32, #tpu.memory_space<vmem>>, vector<1x4x1xf32>,
      %c0_33 = arith.constant 0 : index
      %c0_34 = arith.constant 0 : index
      %51 = vector.load %arg7[%c0_33, %c0_34] : memref<4x1xf32, #tpu.memory_space<vmem>>, vector<4x1xf32>
      %c0_35 = arith.constant 0 : index
      %c0_36 = arith.constant 0 : index
      %c2 = arith.constant 2 : index
      %52 = vector.load %arg4[%c0_35, %c0_36, %c2] : memref<1x4x3xf32, #tpu.memory_space<vmem>>, vector<1x4x1xf32>
      %53 = vector.shape_cast %52 : vector<1x4x1xf32> to vector<4x1xf32>
      %54 = vector.shape_cast %51 : vector<4x1xf32> to vector<1x4x1xf32>
      tpu.vector_store %arg4[%c0_35, %c0_36, %c2], %54 {strides = array<i32>} : memref<1x4x3xf32, #tpu.memory_space<vmem>>, vector<1x4x1xf32>,
    } else {
    }
    return
  }
  func.func @transform_0(%arg0: i32, %arg1: i32) -> (i32, i32, i32) {
    %c0_i32 = arith.constant 0 : i32
    %c0_i32_0 = arith.constant 0 : i32
    return %arg0, %c0_i32, %arg1 : i32, i32, i32
  }
  func.func @transform_1(%arg0: i32, %arg1: i32) -> (i32, i32, i32) {
    %c0_i32 = arith.constant 0 : i32
    %c0_i32_0 = arith.constant 0 : i32
    return %arg0, %c0_i32, %arg1 : i32, i32, i32
  }
  func.func @transform_2(%arg0: i32, %arg1: i32) -> (i32, i32, i32) {
    %c0_i32 = arith.constant 0 : i32
    %c0_i32_0 = arith.constant 0 : i32
    %c0_i32_1 = arith.constant 0 : i32
    return %arg0, %c0_i32, %c0_i32_0 : i32, i32, i32
  }
}

</mosaic_0001>

<bundles_post_ra>
// kernel: tpu_custom_call.1
= control target key start
LH: loop header
LB: loop body
LE: loop exit
PB: predicated region body
PF: predicated region fallthrough
CT: control target
= control target key end

     0   :  { %7 = vsyncpa [#allocation6], 0  ;;  %s813_s0 = inlined_call_operand.hbm [shape: f32[2,4,256], index: 0, kind: input, shape index: {}]   ;;  %s814_s1 = inlined_call_operand.hbm [shape: f32[2,1,256], index: 1, kind: input, shape index: {}]   ;;  %s815_s2 = inlined_call_operand.vmem [shape: f32[2,4,3], index: 2, kind: output, shape index: {}]  }
   0x1   :  { %9 = vsyncpa [#allocation6 + $0x1], 0 }
   0x2   :  { %10 = vsyncpa [#allocation8], 0 }
   0x3   :  { %12 = vsyncpa [#allocation8 + $0x1], 0  ;;  %s689_s9 = smov 0   ;;  %s691_s10 = smov 0  }
   0x4   :  { %s693_s11 = smov 0   ;;  %s695_s12 = smov 0  }
   0x5   :  { %s697_s13 = smov 0   ;;  %s699_s14 = smov 0  }
   0x6 LB: > { %s468_s15 = sadd.s32 4294967295, %s669_s14   ;;  %s30_s16 = sadd.s32 1, %s665_s13  ;;  %s669_s14 = sphi %s699_s14, %s18_s14   ;;  %s665_s13 = sphi %s697_s13, %s823_s13   ;;  %s661_s12 = sphi %s695_s12, %s822_s12   ;;  %s657_s11 = sphi %s693_s11, %s821_s11   ;;  %s653_s10 = sphi %s691_s10, %s820_s10   ;;  %s649_s9 = sphi %s689_s9, %s819_s9  }
   0x7   : > { %p32_p0 = scmp.ge.s32.totalorder %s30_s16, 2  ;;  %s39_s17 = sadd.s32 1, %s657_s11 }
   0x8   : > { %p46_p1 = scmp.ne.s32.totalorder %s657_s11, %s653_s10  ;;  %p47_p2 = scmp.eq.s32.totalorder %s669_s14, 0 }
   0x9   : > { %s825_s16 = smov (%p32_p0, %s30_s16), 0  ;;  %p52_p4 = scmp.ne.s32.totalorder %s653_s10, %s649_s9 }
   0xa   : > { %p725_p3 = por %p47_p2, %p46_p1  ;;  %s34_s19 = ssub.s32 %s665_s13, %s825_s16 }
   0xb   : > { %p53_p5 = scmp.eq.s32.totalorder %s468_s15, 0  ;;  %p37_p6 = scmp.eq.s32.totalorder %s34_s19, 0 }
   0xc   : > { %p497_p8 = scmp.lt.s32.totalorder %s669_s14, 2  ;;  %s130_s22 = sand.u32 1, %s657_s11  }
   0xd   : > { %p732_p7 = por %p53_p5, %p52_p4  ;;  %s485_s23 = sshll.u32 %s665_s13, 3 }
   0xe   : > { %s738_s21 = scalar_select %p37_p6, %s657_s11, %s39_s17  }
   0xf   : > { %s472_s24 = sshll.u32 %s130_s22, 3  ;;  %s141_s27 = scalar_lea.hbm %s813_s0, %s485_s23 }
  0x10   : > { %s143_s28 = sshll.u32 %s141_s27, 4  ;;  %s134_s29 = scalar_lea.vmem [#allocation5], %s472_s24  ;;  %s144_s28 = int_to_ptr.hbm [resolvable:$true] %s143_s28 }
  0x11   : > { %s145_s30 = sshll.u32 %s134_s29, 4  ;;  %p747_p9 = pnand %p497_p8, %p725_p3  ;;  %s146_s30 = int_to_ptr.vmem [resolvable:$true] %s145_s30 }
  0x12   : > { %p477_p10 = scmp.ge.s32.totalorder %s669_s14, 1  ;;  %p171_p11 = scmp.lt.s32.totalorder %s669_s14, 3 }
  0x13   : > { %s475_s4 = sshll.u32 %s130_s22, 1  ;;  %s131_s5 = scalar_lea.sflag [#allocation6], %s130_s22 }
  0x14   : > { %493 = dma.hbm_to_vmem [thread:$0]  (!%p747_p9), %s144_s28, 128, %s146_s30, %s131_s5  }
  0x15   : > { %p172_p12 = pnand %p477_p10, %p171_p11  ;;  %s476_s6 = sshll.u32 %s665_s13, 1 }
  0x16   : > { %s156_s7 = scalar_lea.vmem [#allocation7], %s475_s4  ;;  %s162_s17 = scalar_lea.hbm %s814_s1, %s476_s6 }
  0x17   : > { %s166_s8 = sshll.u32 %s156_s7, 4  ;;  %s164_s18 = sshll.u32 %s162_s17, 4  ;;  %s167_s8 = int_to_ptr.vmem [resolvable:$true] %s166_s8  ;;  %s165_s18 = int_to_ptr.hbm [resolvable:$true] %s164_s18 }
  0x18   : > { %s153_s19 = scalar_lea.sflag [#allocation8], %s130_s22  ;;  %175 = sbr.rel (%p172_p12) target bundleno = 343 (0x157), region = 28 }
  0x19   : > { %496 = dma.hbm_to_vmem [thread:$0]  (!%p747_p9), %s165_s18, 32, %s167_s8, %s153_s19  }
  0x1a   : > { %s177_s23 = sand.u32 (!%p172_p12), 1, %s653_s10  }
  0x1b   : > { %s478_s24 = sshll.u32 (!%p172_p12), %s177_s23, 3  ;;  %s178_s25 = scalar_lea.sflag (!%p172_p12), [#allocation6], %s177_s23 }
  0x1c   : > { %s181_s26 = scalar_lea.vmem (!%p172_p12), [#allocation5], %s478_s24 }
  0x1d   : > { %640 = dma.done.wait (%p732_p7), %s178_s25, 128  }
  0x1e   : > { %642 = vsyncadd (%p732_p7), %s178_s25, 4294967168  ;;  %s479_s27 = sshll.u32 %s177_s23, 1  ;;  %s188_s28 = scalar_lea.sflag [#allocation8], %s177_s23 }
  0x1f   : > { %s191_s29 = scalar_lea.vmem [#allocation7], %s479_s27 }
  0x20   : > { %644 = dma.done.wait (%p732_p7), %s188_s28, 32  }
  0x21   : > { %646 = vsyncadd (%p732_p7), %s188_s28, 4294967264  ;;  %v233_v0 = vlaneseq  ;;  %v232_v3 = vld [vmem:[%s191_s29] sm:$0x3]  ;;  %v231_v4 = vld [vmem:[%s181_s26] sm:$0xff]  ;;  %vm249_vm2 = vcmask 1043456   ;;  %v671_v7 = vmov 0.0  }
  0x22   : > { %v237_v5 = vperm.slane %v232_v3, 0  ;;  %v238_v6 = vperm.slane %v232_v3, 1  ;;  %244 = vst [vmem:[#allocation1] ss:$2 sm:$0xff] %v231_v4  ;;  %vm227_vm3 = vcmask 3072   ;;  %s672_s20 = smov 1  }
  0x23   : > { %v234_v1 = vshrl.u32 %v233_v0, 7  ;;  %229 = vst.msk [vmem:[#allocation3] sm:$0xf] %vm227_vm3, %v671_v7  ;;  %p219_p13 = scmp.lt.s32.totalorder %s661_s12, 1  ;;  %s673_s5 = smov 2   ;;  %vm358_vm4 = vcmask 11272  }
  0x24   : > { %228 = vst.msk [vmem:[#allocation2] sm:$0xf] %vm227_vm3, %v671_v7  ;;  %vm365_vm5 = vcmask 19472  }
  0x25   : > { %v235_v2 = vcvt.s32.f32 %v234_v1  ;;  %230 = vst.msk [vmem:[#allocation4] sm:$0xf] %vm227_vm3, %v671_v7  ;;  %s827_s12 = smov (!%p219_p13, %s661_s12), 1 }
  0x26   : > { %s480_s22 = sshll.u32 %s827_s12, 2 }
  0x27   : > { %vm241_vm0 = vcmp.ne.f32.partialorder %v237_v5, %v235_v2  ;;  %vm242_vm1 = vcmp.ne.f32.partialorder %v238_v6, %v235_v2  ;;  %s222_s4 = scalar_lea.vmem %s815_s2, %s480_s22 }
  0x28   : > { %v481_v8 = vsel %vm241_vm0, 1.0, %v671_v7  ;;  %v482_v9 = vsel %vm242_vm1, 1.0, %v671_v7 }
  0x29   : > { %v326_v10 = vsel %vm249_vm2, %v481_v8, 0.0  ;;  %v327_v11 = vsel %vm249_vm2, %v482_v9, 0.0  ;;  %v245_v13 = vld.sshfl [vmem:[#allocation1] sm:$0xff pattern:$0x75316420]  ;;  %v307_v51 = vrot.slane %v482_v9, 4 }
  0x2a   : > { %v328_v12 = vadd.f32 %v327_v11, %v326_v10  ;;  %v246_v14 = vld.sshfl [vmem:[#allocation1 + $0x8] sm:$0xff pattern:$0x75316420]  ;;  %v250_v15 = vsel %vm249_vm2, %v245_v13, -inf }
  0x2b   : > { %v257_v16 = vsel %vm249_vm2, %v246_v14, -inf  ;;  %v251_v17 = vrot.slane %v250_v15, 4  ;;  %v308_v55 = vsel %vm249_vm2, %v481_v8, %v307_v51  ;;  %v325_v5 = vld [vmem:[#allocation3] sm:$0xf]  ;;  %v304_v9 = vld [vmem:[#allocation2] sm:$0xf] }
  0x2c   : > { %329 = vadd.xlane.f32.xlu0 %v328_v12  ;;  %v258_v18 = vrot.slane %v257_v16, 4  ;;  %v333_v12 = vld [vmem:[#allocation4] sm:$0xf] }
  0x2d   : > { %v252_v19 = vmax.f32 %v250_v15, %v251_v17 }
  0x2e   : > { %v259_v20 = vmax.f32 %v257_v16, %v258_v18 }
  0x2f   : > { %v253_v21 = vrot.slane %v252_v19, 2 }
  0x30   : > { %v260_v22 = vrot.slane %v259_v20, 2 }
  0x31   : > { %v254_v23 = vmax.f32 %v252_v19, %v253_v21 }
  0x32   : > { %v261_v24 = vmax.f32 %v259_v20, %v260_v22 }
  0x33   : > { %v255_v25 = vrot.slane %v254_v23, 1 }
  0x34   : > { %v262_v26 = vrot.slane %v261_v24, 1 }
  0x35   : > { %v256_v27 = vmax.f32 %v254_v23, %v255_v25 }
  0x36   : > { %v263_v28 = vmax.f32 %v261_v24, %v262_v26 }
  0x38   : > { %v266_v29 = vrot.slane %v263_v28, 4 }
  0x3a   : > { %v267_v30 = vsel %vm249_vm2, %v256_v27, %v266_v29 }
  0x3b   : > { %v269_v31 = vsub.f32 %v231_v4, %v267_v30 }
  0x3d   : > { %v270_v32 = vmul.f32 1.442695, %v269_v31 }
  0x3f   : > { %549 = vpow2.f32 %v270_v32 }
  0x45   : > { %v550_v33 = vpop.eup %549 }
  0x46   : > { %273 = vst [vmem:[#allocation1] ss:$2 sm:$0xff] %v550_v33 }
  0x4d   : > { %v274_v34 = vld.sshfl [vmem:[#allocation1] sm:$0xff pattern:$0x75316420]  ;;  %v275_v35 = vld.sshfl [vmem:[#allocation1 + $0x8] sm:$0xff pattern:$0x75316420] }
  0x4e   : > { %v278_v36 = vsel %vm249_vm2, %v274_v34, 0.0  ;;  %v285_v37 = vsel %vm249_vm2, %v275_v35, 0.0 }
  0x4f   : > { %v279_v38 = vrot.slane %v278_v36, 4  ;;  %v286_v39 = vrot.slane %v285_v37, 4 }
  0x51   : > { %v280_v40 = vadd.f32 %v279_v38, %v278_v36  ;;  %v287_v41 = vadd.f32 %v286_v39, %v285_v37 }
  0x53   : > { %v281_v42 = vrot.slane %v280_v40, 2  ;;  %v288_v43 = vrot.slane %v287_v41, 2 }
  0x55   : > { %v282_v44 = vadd.f32 %v281_v42, %v280_v40  ;;  %v289_v45 = vadd.f32 %v288_v43, %v287_v41 }
  0x57   : > { %v283_v46 = vrot.slane %v282_v44, 1  ;;  %v290_v47 = vrot.slane %v289_v45, 1 }
  0x59   : > { %v284_v48 = vadd.f32 %v283_v46, %v282_v44  ;;  %v291_v49 = vadd.f32 %v290_v47, %v289_v45 }
  0x5b   : > { %551 = vrcp.f32 %v284_v48 }
  0x5c   : > { %553 = vrcp.f32 %v291_v49 }
  0x61   : > { %v552_v50 = vpop.eup %551 }
  0x62   : > { %v554_v52 = vpop.eup %553 }
  0x63   : > { %v296_v53 = vrot.slane %v554_v52, 4 }
  0x65   : > { %v297_v54 = vsel %vm249_vm2, %v552_v50, %v296_v53 }
  0x66   : > { %v299_v56 = vmul.f32 %v550_v33, %v297_v54 }
  0x68   : > { %v310_v57 = vmul.f32 %v308_v55, %v299_v56  ;;  %v334_v58 = vmul.f32 %v299_v56, %v299_v56 }
  0x6a   : > { %312 = vst [vmem:[#allocation1] ss:$2 sm:$0xff] %v310_v57 }
  0x71   : > { %v313_v59 = vld.sshfl [vmem:[#allocation1] sm:$0xff pattern:$0x75316420]  ;;  %v314_v60 = vld.sshfl [vmem:[#allocation1 + $0x8] sm:$0xff pattern:$0x75316420] }
  0x72   : > { %336 = vst [vmem:[#allocation1] ss:$2 sm:$0xff] %v334_v58  ;;  %v317_v61 = vsel %vm249_vm2, %v313_v59, 0.0  ;;  %v318_v62 = vsel %vm249_vm2, %v314_v60, 0.0 }
  0x73   : > { %v319_v63 = vadd.f32 %v318_v62, %v317_v61 }
  0x75   : > { %320 = vadd.xlane.f32.xlu1 %v319_v63 }
  0x79   : > { %v337_v0 = vld.sshfl [vmem:[#allocation1] sm:$0xff pattern:$0x75316420]  ;;  %v338_v1 = vld.sshfl [vmem:[#allocation1 + $0x8] sm:$0xff pattern:$0x75316420] }
  0x7a   : > { %v341_v2 = vsel %vm249_vm2, %v337_v0, 0.0  ;;  %v342_v3 = vsel %vm249_vm2, %v338_v1, 0.0 }
  0x7b   : > { %v343_v4 = vadd.f32 %v342_v3, %v341_v2 }
  0x7d   : > { %344 = vadd.xlane.f32.xlu0 %v343_v4 }
  0x9f   : > { %v330_v6 = vpop.xlane.xlu0 %329 }
  0xa0   : > { %v331_v7 = vadd.f32 %v330_v6, %v325_v5 }
  0xa2   : > { %332 = vst.msk [vmem:[#allocation3] sm:$0xf] %vm227_vm3, %v331_v7 }
  0xa9   : > { %v353_v8 = vld [vmem:[#allocation3] sm:$0xf] }
  0xaa   : > { %355 = vrot.lane.b32.xlu1 %v353_v8, %s672_s20 }
  0xe8   : > { %v321_v10 = vpop.xlane.xlu1 %320 }
  0xe9   : > { %v322_v11 = vadd.f32 %v321_v10, %v304_v9 }
  0xeb   : > { %324 = vst.msk [vmem:[#allocation2] sm:$0xf] %vm227_vm3, %v322_v11 }
  0xf0   : > { %v345_v13 = vpop.xlane.xlu0 %344 }
  0xf1   : > { %v346_v14 = vadd.f32 %v345_v13, %v333_v12 }
  0xf2   : > { %v351_v16 = vld [vmem:[#allocation2] sm:$0xf] }
  0xf3   : > { %347 = vst.msk [vmem:[#allocation4] sm:$0xf] %vm227_vm3, %v346_v14 }
  0xf4   : > { %352 = vst.msk [vmem:[%s222_s4] sm:$0xf] %vm227_vm3, %v351_v16 }
  0xfa   : > { %v360_v15 = vld [vmem:[#allocation4] sm:$0xf] }
  0xfb   : > { %362 = vrot.lane.b32.xlu2 %v360_v15, %s673_s5 }
 0x11c   : > { %v356_v17 = vpop.permute.xlu1 %355 }
 0x11d   : > { %359 = vst.msk [vmem:[%s222_s4] sm:$0xf] %vm358_vm4, %v356_v17 }
 0x155   : > { %v363_v18 = vpop.permute.xlu2 %362 }
 0x156   : > { %366 = vst.msk [vmem:[%s222_s4] sm:$0xf] %vm365_vm5, %v363_v18 }
 0x157 PF: > { %s18_s14 = sadd.s32 1, %s669_s14   ;;  %s819_s9 = smov %s653_s10 }
 0x158   : > { %p15_p0 = scmp.ge.s32.totalorder %s18_s14, 4   ;;  %s820_s10 = smov %s657_s11 }
 0x159   : > { %s821_s11 = smov %s738_s21  ;;  %s822_s12 = smov %s665_s13 }
 0x15a   : > { %s823_s13 = smov %s825_s16  ;;  %17 = sbr.rel (!%p15_p0) target bundleno = 6 (0x6), region = 89 }
 0x15f   :  { %386 = vsyncpa [#allocation6], 1 }
 0x160   :  { %388 = vsyncpa [#allocation6 + $0x1], 1 }
 0x161   :  { %389 = vsyncpa [#allocation8], 1 }
 0x162   :  { %391 = vsyncpa [#allocation8 + $0x1], 1 }

</bundles_post_ra>
